<compile_context>
chip_gen: v7x
topology: tpu7x:2x2x1
jax: 0.10.0
libtpu: 0.0.40
codegen_flags: <defaults>
</compile_context>

<pallas_src>
import math

import jax
import jax.numpy as jnp
from jax.experimental import pallas as pl
from jax.experimental.pallas import tpu as pltpu


# ------------------------------- kernels ----------------------------------- #
def _rope_roll_kernel(x_ref, cos_ref, sin_ref, o_ref):
    """Pair-swap via lane rotations (used when D % 128 == 0)."""
    x = x_ref[...]                                    # (R, D), native dtype
    d = x.shape[-1]
    x_next = pltpu.roll(x, d - 1, axis=1)             # out[j] = x[(j + 1) % d]
    x_prev = pltpu.roll(x, 1, axis=1)                 # out[j] = x[(j - 1) % d]
    lane = jax.lax.broadcasted_iota(jnp.int32, x.shape, 1)
    swap = jnp.where((lane & 1) == 0, x_next, x_prev)
    y = (x.astype(jnp.float32) * cos_ref[...]
         + swap.astype(jnp.float32) * sin_ref[...])
    o_ref[...] = y.astype(o_ref.dtype)


def _rope_perm_kernel(x_ref, cos_ref, sin_ref, perm_ref, o_ref):
    """Pair-swap via a constant (D, D) 0/1 permutation matmul (any even D)."""
    x = x_ref[...]                                    # (R, D), native dtype
    swap = jnp.dot(x, perm_ref[...], preferred_element_type=jnp.float32)
    y = x.astype(jnp.float32) * cos_ref[...] + swap * sin_ref[...]
    o_ref[...] = y.astype(o_ref.dtype)


# ------------------------------ tiling logic -------------------------------- #
_X_BLOCK_BYTES = 2 * 1024 * 1024  # target x bytes per block (keeps VMEM modest)


def _divisors(n):
    out = []
    i = 1
    while i * i <= n:
        if n % i == 0:
            out.append(i)
            if i != n // i:
                out.append(n // i)
        i += 1
    return sorted(out)


def _choose_tiles(B, S, D, itemsize):
    """Pick (b_tile, s_tile); rows per block = b_tile * s_tile, lane dim = D.

    The block's row count must be a multiple of 8 (sublane rule) or span the
    whole array.  b_tile > 1 is only used when blocks cover whole sequences
    (s_tile == S) so flattened row blocks stay aligned with the cos/sin tables.
    """
    budget = _X_BLOCK_BYTES
    row_bytes = max(1, D * itemsize)

    if S % 8 == 0:
        s_cands = [d for d in _divisors(S) if d % 8 == 0 and d * row_bytes <= budget]
        s_tile = max(s_cands) if s_cands else 8
    else:
        s_tile = S  # full-dim block is always legal

    if s_tile == S:
        b_cands = [d for d in _divisors(B)
                   if (d * S) % 8 == 0 and d * S * row_bytes <= budget]
        b_tile = max(b_cands) if b_cands else 1
        if (b_tile * S) % 8 != 0 and b_tile != B:
            # Rare (S not a multiple of 8): fall back to one full-array block.
            b_tile = B
    else:
        b_tile = 1
    return b_tile, s_tile


# -------------------------------- wrapper ----------------------------------- #
def rope_pallas(x, cos_i, sin_i):
    """Apply interleaved RoPE to x of shape [..., S, D] (D even).

    cos_i / sin_i are the pre-expanded interleaved f32 tables of shape
    [max_seq_len, D] produced by expand_rope_tables().
    """
    *batch_dims, S, D = x.shape
    if D % 2 != 0:
        raise ValueError(f"dim must be even, got {D}")
    if cos_i.shape[-1] != D or sin_i.shape[-1] != D:
        raise ValueError("rotary table dim does not match input dim")
    if S > cos_i.shape[0]:
        raise ValueError(f"seq_len {S} exceeds max_seq_len {cos_i.shape[0]}")

    B = math.prod(batch_dims)
    itemsize = jnp.dtype(x.dtype).itemsize
    b_tile, s_tile = _choose_tiles(B, S, D, itemsize)
    m = S // s_tile             # S-tiles per sequence
    g = B // b_tile             # batch groups
    R = b_tile * s_tile         # rows per block

    x2 = x.reshape(B * S, D)    # free reshape, interleaved layout untouched
    cos_t = cos_i[:S]
    sin_t = sin_i[:S]
    if b_tile > 1:              # a block spans b_tile whole sequences
        cos_t = jnp.tile(cos_t, (b_tile, 1))
        sin_t = jnp.tile(sin_t, (b_tile, 1))

    row_spec = pl.BlockSpec((R, D), lambda si, gi: (gi * m + si, 0))
    tab_spec = pl.BlockSpec((R, D), lambda si, gi: (si, 0))  # resident over gi

    if D % 128 == 0:
        kernel = _rope_roll_kernel
        operands = (x2, cos_t, sin_t)
        in_specs = [row_spec, tab_spec, tab_spec]
        perm_bytes = 0
    else:
        j = jnp.arange(D, dtype=jnp.int32)
        pair = j + 1 - 2 * (j % 2)                              # 0<->1, 2<->3, ...
        perm = (pair[:, None] == j[None, :]).astype(x.dtype)    # (D, D) 0/1, exact
        kernel = _rope_perm_kernel
        operands = (x2, cos_t, sin_t, perm)
        in_specs = [row_spec, tab_spec, tab_spec,
                    pl.BlockSpec((D, D), lambda si, gi: (0, 0))]
        perm_bytes = 2 * D * D * itemsize

    blk_x = R * D * itemsize
    blk_t = R * D * 4
    vmem_limit = 4 * blk_x + 4 * blk_t + perm_bytes + (4 << 20)
    vmem_limit = int(min(vmem_limit, 48 << 20))  # stays under v7x 64 MiB physical

    y2 = pl.pallas_call(
        kernel,
        out_shape=jax.ShapeDtypeStruct((B * S, D), x.dtype),
        grid=(m, g),
        in_specs=in_specs,
        out_specs=row_spec,
        compiler_params=pltpu.CompilerParams(
            dimension_semantics=("parallel", "parallel"),
            vmem_limit_bytes=vmem_limit,
        ),
    )(*operands)
    return y2.reshape(x.shape)


# ------------------------- module-equivalent setup -------------------------- #
def make_rope_tables(dim, max_seq_len=2048):
    """Base buffers exactly as in the PyTorch __init__ (f32, [L, dim//2])."""
    freqs = 1.0 / (10000.0 ** (jnp.arange(0, dim, 2, dtype=jnp.float32) / dim))
    positions = jnp.arange(max_seq_len, dtype=jnp.float32)
    phases = jnp.outer(positions, freqs)
    return jnp.cos(phases), jnp.sin(phases)


def expand_rope_tables(cos, sin):
    """One-time expansion to interleaved f32 [L, D] tables (like extra buffers)."""
    _, H = cos.shape
    cos_i = jnp.repeat(cos.astype(jnp.float32), 2, axis=-1)          # [L, 2H]
    sign = jnp.tile(jnp.array([-1.0, 1.0], jnp.float32), H)          # -,+,-,+,...
    sin_i = jnp.repeat(sin.astype(jnp.float32), 2, axis=-1) * sign   # [L, 2H]
    return cos_i, sin_i


def rope_reference(x, cos, sin):
    """Pure-JAX mirror of the PyTorch forward (f32 math, output in x.dtype)."""
    *_, S, D = x.shape
    c = cos[:S].astype(jnp.float32)
    s = sin[:S].astype(jnp.float32)
    xe = x[..., 0::2].astype(jnp.float32)
    xo = x[..., 1::2].astype(jnp.float32)
    re = xe * c - xo * s
    ro = xe * s + xo * c
    y = jnp.stack([re, ro], axis=-1).reshape(x.shape)
    return y.astype(x.dtype)


if __name__ == "__main__":
    key = jax.random.PRNGKey(0)
    cases = [
        # (batch_dims, seq_len, dim, max_seq_len, dtype, abs_tol)
        ((2, 4), 8, 32, 64, jnp.float32, 1e-5),    # dim % 128 != 0 -> MXU perm path
        ((2, 2), 16, 128, 32, jnp.float32, 1e-5),  # dim % 128 == 0 -> XLU roll path
        ((3,), 8, 64, 16, jnp.bfloat16, 6e-2),     # bf16 in/out, f32 math inside
    ]
    for bdims, S, D, L, dt, tol in cases:
        cos_t, sin_t = make_rope_tables(D, L)
        cos_i, sin_i = expand_rope_tables(cos_t, sin_t)
        key, sub = jax.random.split(key)
        x = jax.random.normal(sub, (*bdims, S, D), dtype=dt)

        y = jax.block_until_ready(rope_pallas(x, cos_i, sin_i))
        y_ref = rope_reference(x, cos_t, sin_t)

        assert y.shape == x.shape and y.dtype == x.dtype
        err = float(jnp.max(jnp.abs(y.astype(jnp.float32) - y_ref.astype(jnp.float32))))
        assert err <= tol, (bdims, S, D, str(dt), err)
    print("KERNEL_OK")
</pallas_src>

<mosaic_0001>
module attributes {stable_mosaic.version = 11 : i64} {
  func.func @_rope_perm_kernel(%arg0: i32, %arg1: i32, %arg2: memref<64x32xf32, #tpu.memory_space<vmem>>, %arg3: memref<64x32xf32, #tpu.memory_space<vmem>>, %arg4: memref<64x32xf32, #tpu.memory_space<vmem>>, %arg5: memref<32x32xf32, #tpu.memory_space<vmem>>, %arg6: memref<64x32xf32, #tpu.memory_space<vmem>>) attributes {dimension_semantics = [#tpu.dimension_semantics<parallel>, #tpu.dimension_semantics<parallel>], iteration_bounds = array<i64: 1, 1>, scalar_prefetch = 0 : i64, scratch_operands = 0 : i64, tpu.core_type = #tpu.core_type<tc>, window_params = [{transform_indices = @transform_0, window_bounds = array<i64: 64, 32>}, {transform_indices = @transform_1, window_bounds = array<i64: 64, 32>}, {transform_indices = @transform_2, window_bounds = array<i64: 64, 32>}, {pipeline_mode = #tpu.pipeline_mode<synchronous>, transform_indices = @transform_3, window_bounds = array<i64: 32, 32>}, {transform_indices = @transform_4, window_bounds = array<i64: 64, 32>}]} {
    %c0 = arith.constant 0 : index
    %c0_0 = arith.constant 0 : index
    %0 = vector.load %arg2[%c0, %c0_0] : memref<64x32xf32, #tpu.memory_space<vmem>>, vector<64x32xf32>
    %c0_1 = arith.constant 0 : index
    %c0_2 = arith.constant 0 : index
    %1 = vector.load %arg5[%c0_1, %c0_2] : memref<32x32xf32, #tpu.memory_space<vmem>>, vector<32x32xf32>
    %cst = arith.constant dense<0.000000e+00> : vector<64x32xf32>
    %2 = tpu.matmul %0, %1, %cst {dimension_numbers = #tpu.dot_dimension_numbers<[1], [0], [0], [1], [0, 0, 1, 1], [], []>} : vector<64x32xf32>, vector<32x32xf32>, vector<64x32xf32> -> vector<64x32xf32>
    %c0_3 = arith.constant 0 : index
    %c0_4 = arith.constant 0 : index
    %3 = vector.load %arg3[%c0_3, %c0_4] : memref<64x32xf32, #tpu.memory_space<vmem>>, vector<64x32xf32>
    %4 = arith.mulf %0, %3 : vector<64x32xf32>
    %c0_5 = arith.constant 0 : index
    %c0_6 = arith.constant 0 : index
    %5 = vector.load %arg4[%c0_5, %c0_6] : memref<64x32xf32, #tpu.memory_space<vmem>>, vector<64x32xf32>
    %6 = arith.mulf %2, %5 : vector<64x32xf32>
    %7 = arith.addf %4, %6 : vector<64x32xf32>
    %c0_7 = arith.constant 0 : index
    %c0_8 = arith.constant 0 : index
    %8 = vector.load %arg6[%c0_7, %c0_8] : memref<64x32xf32, #tpu.memory_space<vmem>>, vector<64x32xf32>
    tpu.vector_store %arg6[%c0_7, %c0_8], %7 {strides = array<i32>} : memref<64x32xf32, #tpu.memory_space<vmem>>, vector<64x32xf32>,
    return
  }
  func.func @transform_0(%arg0: i32, %arg1: i32) -> (i32, i32) {
    %c1_i32 = arith.constant 1 : i32
    %0 = arith.muli %arg1, %c1_i32 : i32
    %1 = arith.addi %0, %arg0 : i32
    %c0_i32 = arith.constant 0 : i32
    %c0_i32_0 = arith.constant 0 : i32
    return %1, %c0_i32 : i32, i32
  }
  func.func @transform_1(%arg0: i32, %arg1: i32) -> (i32, i32) {
    %c0_i32 = arith.constant 0 : i32
    %c0_i32_0 = arith.constant 0 : i32
    return %arg0, %c0_i32 : i32, i32
  }
  func.func @transform_2(%arg0: i32, %arg1: i32) -> (i32, i32) {
    %c0_i32 = arith.constant 0 : i32
    %c0_i32_0 = arith.constant 0 : i32
    return %arg0, %c0_i32 : i32, i32
  }
  func.func @transform_3(%arg0: i32, %arg1: i32) -> (i32, i32) {
    %c0_i32 = arith.constant 0 : i32
    %c0_i32_0 = arith.constant 0 : i32
    %c0_i32_1 = arith.constant 0 : i32
    return %c0_i32, %c0_i32_0 : i32, i32
  }
  func.func @transform_4(%arg0: i32, %arg1: i32) -> (i32, i32) {
    %c1_i32 = arith.constant 1 : i32
    %0 = arith.muli %arg1, %c1_i32 : i32
    %1 = arith.addi %0, %arg0 : i32
    %c0_i32 = arith.constant 0 : i32
    %c0_i32_0 = arith.constant 0 : i32
    return %1, %c0_i32 : i32, i32
  }
}

</mosaic_0001>

<bundles_post_ra>
// kernel: tpu_custom_call.1
= control target key start
LH: loop header
LB: loop body
LE: loop exit
PB: predicated region body
PF: predicated region fallthrough
CT: control target
= control target key end

     0   :  { %vm65_vm0 = vcmask 261120   ;;  %s476_s3 = inlined_call_operand.vmem [shape: f32[32,32], index: 3, kind: input, shape index: {}]   ;;  %s477_s0 = inlined_call_operand.vmem [shape: f32[64,32], index: 0, kind: input, shape index: {}]   ;;  %s478_s1 = inlined_call_operand.vmem [shape: f32[64,32], index: 1, kind: input, shape index: {}]   ;;  %s479_s2 = inlined_call_operand.vmem [shape: f32[64,32], index: 2, kind: input, shape index: {}]   ;;  %s480_s4 = inlined_call_operand.vmem [shape: f32[64,32], index: 4, kind: output, shape index: {}]  }
   0x1   :  { %v61_v0 = vld [vmem:[%s476_s3] sm:$0xff]  ;;  %v62_v1 = vld [vmem:[%s476_s3 + $0x8] sm:$0xff]  ;;  %v63_v2 = vld [vmem:[%s476_s3 + $0x10] sm:$0xff] }
   0x2   :  { %v315_v3 = vpack.c.bf16 %v62_v1, %v61_v0  ;;  %v64_v4 = vld [vmem:[%s476_s3 + $0x18] sm:$0xff]  ;;  %v53_v5 = vld [vmem:[%s477_s0] sm:$0xff]  ;;  %v54_v8 = vld [vmem:[%s477_s0 + $0x8] sm:$0xff] }
   0x3   :  { %v319_v6 = vpack.c.bf16 %v64_v4, %v63_v2  ;;  %303 = vmatprep.mubr.msk.f32.mxu0 %vm65_vm0, %v53_v5  ;;  %v57_v7 = vld [vmem:[%s477_s0 + $0x20] sm:$0xff]  ;;  %v58_v9 = vld [vmem:[%s477_s0 + $0x28] sm:$0xff]  ;;  %v55_v10 = vld [vmem:[%s477_s0 + $0x10] sm:$0xff] }
   0x4   :  { %316 = vmatprep.subr.bf16.mxu0 %v315_v3  ;;  %323 = vmatprep.subr.bf16.mxu1 %v315_v3  ;;  %v59_v11 = vld [vmem:[%s477_s0 + $0x30] sm:$0xff]  ;;  %v56_v12 = vld [vmem:[%s477_s0 + $0x18] sm:$0xff]  ;;  %v196_v14 = vld [vmem:[%s478_s1 + $0x8] sm:$0xff] }
   0x5   :  { %318 = vmatpush3.bf16.msra.mxu0 %v315_v3  ;;  %325 = vmatpush3.bf16.msra.mxu1 %v315_v3  ;;  %v60_v13 = vld [vmem:[%s477_s0 + $0x38] sm:$0xff]  ;;  %v200_v15 = vld [vmem:[%s478_s1 + $0x28] sm:$0xff]  ;;  %v195_v16 = vld [vmem:[%s478_s1] sm:$0xff]  ;;  %v204_v20 = vmul.f32 %v196_v14, %v54_v8 }
   0x6   :  { %320 = vmatprep.subr.bf16.mxu0 %v319_v6  ;;  %324 = vmatprep.subr.bf16.mxu1 %v319_v6  ;;  %v199_v17 = vld [vmem:[%s478_s1 + $0x20] sm:$0xff]  ;;  %v212_v18 = vld [vmem:[%s479_s2 + $0x8] sm:$0xff]  ;;  %v208_v21 = vmul.f32 %v200_v15, %v58_v9  ;;  %v203_v24 = vmul.f32 %v195_v16, %v53_v5  ;;  %v198_v28 = vld [vmem:[%s478_s1 + $0x18] sm:$0xff] }
   0x7   :  { %309 = vmatprep.mubr.msk.f32.mxu1 %vm65_vm0, %v57_v7  ;;  %v216_v19 = vld [vmem:[%s479_s2 + $0x28] sm:$0xff]  ;;  %v211_v22 = vld [vmem:[%s479_s2] sm:$0xff]  ;;  %v207_v25 = vmul.f32 %v199_v17, %v57_v7  ;;  %v202_v29 = vld [vmem:[%s478_s1 + $0x38] sm:$0xff]  ;;  %v206_v42 = vmul.f32 %v198_v28, %v56_v12 }
   0x8   :  { %v215_v23 = vld [vmem:[%s479_s2 + $0x20] sm:$0xff]  ;;  %v197_v34 = vld [vmem:[%s478_s1 + $0x10] sm:$0xff]  ;;  %v214_v38 = vld [vmem:[%s479_s2 + $0x18] sm:$0xff]  ;;  %v210_v43 = vmul.f32 %v202_v29, %v60_v13 }
   0x9   :  { %322 = vmatpush3.bf16.msra.mxu0 %v319_v6  ;;  %326 = vmatpush3.bf16.msra.mxu1 %v319_v6  ;;  %v201_v35 = vld [vmem:[%s478_s1 + $0x30] sm:$0xff]  ;;  %v218_v39 = vld [vmem:[%s479_s2 + $0x38] sm:$0xff]  ;;  %v205_v50 = vmul.f32 %v197_v34, %v55_v10 }
   0xa   :  { %v213_v44 = vld [vmem:[%s479_s2 + $0x10] sm:$0xff]  ;;  %v209_v51 = vmul.f32 %v201_v35, %v59_v11 }
   0xb   :  { %v217_v45 = vld [vmem:[%s479_s2 + $0x30] sm:$0xff] }
   0xc   :  { %304 = vmatmul.mubr.msk.f32.vlgmr.msra.gmra.mrb[0].mxu0 %vm65_vm0, %v54_v8  ;;  %310 = vmatmul.mubr.msk.f32.vlgmr.msra.gmra.mrb[0].mxu1 %vm65_vm0, %v58_v9 }
   0xd   :  { %306 = vmatprep.mubr.msk.f32.mxu0 %vm65_vm0, %v55_v10  ;;  %312 = vmatprep.mubr.msk.f32.mxu1 %vm65_vm0, %v59_v11 }
  0x10   :  { %307 = vmatmul.mubr.msk.f32.gmra.mrb[2].mxu0 %vm65_vm0, %v56_v12  ;;  %313 = vmatmul.mubr.msk.f32.gmra.mrb[2].mxu1 %vm65_vm0, %v60_v13 }
  0xdf   :  { %v305_v26 = vpop.f32.mrb[0].mxu0  ;;  %v311_v27 = vpop.f32.mrb[0].mxu1 }
  0xe0   :  { %v220_v30 = vmul.f32 %v305_v26, %v212_v18  ;;  %v224_v31 = vmul.f32 %v311_v27, %v216_v19  ;;  %v156_v32 = vpop.f32.mrb[1].mxu0  ;;  %v176_v33 = vpop.f32.mrb[1].mxu1 }
  0xe1   :  { %v219_v36 = vmul.f32 %v211_v22, %v156_v32  ;;  %v223_v37 = vmul.f32 %v215_v23, %v176_v33 }
  0xe2   :  { %v228_v40 = vadd.f32 %v220_v30, %v204_v20  ;;  %v232_v41 = vadd.f32 %v224_v31, %v208_v21 }
  0xe3   :  { %v227_v46 = vadd.f32 %v219_v36, %v203_v24  ;;  %v231_v47 = vadd.f32 %v223_v37, %v207_v25  ;;  %v308_v48 = vpop.f32.mrb[2].mxu0  ;;  %v314_v49 = vpop.f32.mrb[2].mxu1 }
  0xe4   :  { %236 = vst.msk [vmem:[%s480_s4 + $0x8] sm:$0xff] %vm65_vm0, %v228_v40  ;;  %240 = vst.msk [vmem:[%s480_s4 + $0x28] sm:$0xff] %vm65_vm0, %v232_v41  ;;  %v222_v52 = vmul.f32 %v308_v48, %v214_v38  ;;  %v226_v53 = vmul.f32 %v314_v49, %v218_v39  ;;  %v166_v54 = vpop.f32.mrb[3].mxu0  ;;  %v186_v55 = vpop.f32.mrb[3].mxu1 }
  0xe5   :  { %235 = vst.msk [vmem:[%s480_s4] sm:$0xff] %vm65_vm0, %v227_v46  ;;  %239 = vst.msk [vmem:[%s480_s4 + $0x20] sm:$0xff] %vm65_vm0, %v231_v47  ;;  %v221_v56 = vmul.f32 %v213_v44, %v166_v54  ;;  %v225_v57 = vmul.f32 %v217_v45, %v186_v55 }
  0xe6   :  { %v230_v58 = vadd.f32 %v222_v52, %v206_v42  ;;  %v234_v59 = vadd.f32 %v226_v53, %v210_v43 }
  0xe7   :  { %v229_v60 = vadd.f32 %v221_v56, %v205_v50  ;;  %v233_v61 = vadd.f32 %v225_v57, %v209_v51 }
  0xe8   :  { %238 = vst.msk [vmem:[%s480_s4 + $0x18] sm:$0xff] %vm65_vm0, %v230_v58  ;;  %242 = vst.msk [vmem:[%s480_s4 + $0x38] sm:$0xff] %vm65_vm0, %v234_v59 }
  0xe9   :  { %237 = vst.msk [vmem:[%s480_s4 + $0x10] sm:$0xff] %vm65_vm0, %v229_v60  ;;  %241 = vst.msk [vmem:[%s480_s4 + $0x30] sm:$0xff] %vm65_vm0, %v233_v61 }

</bundles_post_ra>
